<compile_context>
chip_gen: v6e
topology: v6e:2x2x1
jax: 0.10.0
libtpu: 0.0.40
codegen_flags: <defaults>
</compile_context>

<pallas_src>
import functools

import jax
import jax.numpy as jnp
from jax import lax
from jax.experimental import pallas as pl
from jax.experimental.pallas import tpu as pltpu


def _dense_single_kernel(x_ref, w_ref, b_ref, out_ref, *,
                         K, dilation, padding, L, negative_slope):
    """One grid step = `batch_block` batch elements, channels-leading layout.

    x_ref   : (C_in, Nb*L)           flattened (batch, length) on lanes
    w_ref   : (C_out, K*C_in)        conv weight with BN scale folded in
    b_ref   : (C_out, 1)             folded BN bias
    out_ref : (C_in + C_out, Nb*L)   concat([x, act], channel axis)
    """
    x = x_ref[...]                                     # (C_in, Nb*L)
    w = w_ref[...]                                     # (C_out, K*C_in)
    bias = b_ref[...]                                  # (C_out, 1)
    C_in, NL = x.shape

    # Position within each length-L batch segment (lane index mod L).
    t = lax.broadcasted_iota(jnp.int32, (C_in, NL), 1) % L

    # im2col slab: tap k needs x[:, j + s] with s = k*dilation - padding,
    # valid only while the shifted position stays inside the same batch
    # segment; out-of-range positions are the conv's zero padding.
    taps = []
    for k in range(K):
        s = k * dilation - padding
        if s == 0:
            taps.append(x)
            continue
        zeros = jnp.zeros((C_in, abs(s)), dtype=x.dtype)
        if s > 0:
            shifted = jnp.concatenate([x[:, s:], zeros], axis=1)
        else:
            shifted = jnp.concatenate([zeros, x[:, :s]], axis=1)
        valid = jnp.logical_and(t + s >= 0, t + s < L)
        taps.append(jnp.where(valid, shifted, jnp.zeros_like(shifted)))
    slab = taps[0] if K == 1 else jnp.concatenate(taps, axis=0)   # (K*C_in, Nb*L)

    # Conv1d (+ folded BN scale) in one MXU matmul; bias + LeakyReLU on the VPU.
    y = jnp.dot(w, slab, preferred_element_type=jnp.float32)      # (C_out, Nb*L)
    y = y + bias
    y = jnp.where(y > 0, y, negative_slope * y)
    # Dropout: identity at inference time.

    # torch.cat([x, out], dim=1): one fused, lane-dense store.
    out_ref[...] = jnp.concatenate(
        [x.astype(out_ref.dtype), y.astype(out_ref.dtype)], axis=0)


def _pick_batch_block(N, L, C_in, C_out, itemsize=4, vmem_budget=16 << 20):
    """Largest batch block whose (double-buffered) in+out tiles fit the budget.

    Only lane-dense blocks (batch_block*L % 128 == 0) or the full batch are
    legal (BlockSpec (8,128) rule); among those we prefer >=2 grid steps so
    both v7x TensorCores get work, otherwise the single fattest block (best on
    1-TC v5e/v6e where every extra grid step is pure ~0.35us overhead).
    """
    def fits(nb):
        blk = itemsize * nb * L * (2 * C_in + C_out)    # in + out block bytes
        return 2 * blk <= vmem_budget                    # double buffered
    cands = [d for d in range(1, N + 1)
             if N % d == 0 and ((d * L) % 128 == 0 or d == N)]
    fitting = [d for d in cands if fits(d)]
    pool = fitting if fitting else [min(cands)]
    multi = [d for d in pool if N // d >= 2]
    return max(multi) if multi else max(pool)


def dense_single_forward(x_ncl, weight, gamma, beta, running_mean, running_var,
                         *, kernel_size, padding, stride, dilation,
                         eps=1e-5, negative_slope=0.01, batch_block=None,
                         use_bf16_inputs=False):
    """x_ncl: (N, C_in, L) like PyTorch. Returns (N, C_in + C_out, L)."""
    N, C_in, L = x_ncl.shape
    C_out = weight.shape[0]
    L_out = (L + 2 * padding - dilation * (kernel_size - 1) - 1) // stride + 1
    # torch.cat([x, out], 1) requires matching spatial length.
    assert L_out == L, "DenseSingle requires conv output length == input length"
    # TODO(synk): stride > 1 not implemented (dead code under the L_out == L
    # concat constraint anyway).
    assert stride == 1, "stride > 1 not supported"
    assert padding < L, "padding must be smaller than the sequence length"

    if batch_block is None:
        batch_block = _pick_batch_block(
            N, L, C_in, C_out, itemsize=2 if use_bf16_inputs else 4)
    assert N % batch_block == 0, "batch_block must divide N"
    assert (batch_block * L) % 128 == 0 or batch_block == N, \
        "block last dim must be a multiple of 128 lanes or the full extent"

    # Fold BatchNorm (inference stats) into the conv weight / bias.
    scale = (gamma / jnp.sqrt(running_var + eps)).astype(jnp.float32)   # (C_out,)
    w_eff = weight.astype(jnp.float32) * scale[:, None, None]           # (C_out, C_in, K)
    # Flatten to (C_out, K*C_in) matching the slab ordering j = k*C_in + c_in.
    w2d = jnp.transpose(w_eff, (0, 2, 1)).reshape(C_out, kernel_size * C_in)
    bias = (beta.astype(jnp.float32)
            - running_mean.astype(jnp.float32) * scale).reshape(C_out, 1)

    # Channels-leading lane-dense layout: (C_in, N*L).
    in_dtype = jnp.bfloat16 if use_bf16_inputs else jnp.float32
    x_flat = jnp.transpose(x_ncl, (1, 0, 2)).reshape(C_in, N * L).astype(in_dtype)
    w2d = w2d.astype(in_dtype)

    C_tot = C_in + C_out
    nl_blk = batch_block * L

    # Explicit VMEM budgeting (v7x has only 64 MiB physical / 32 MiB default
    # scoped); only raise the limit when the blocks actually need it.
    itemsize = 2 if use_bf16_inputs else 4
    blk_bytes = itemsize * C_in * nl_blk + 4 * C_tot * nl_blk
    vmem_limit = None
    if 3 * blk_bytes > (32 << 20):
        vmem_limit = int(min(4 * blk_bytes, 64 << 20))

    kern = functools.partial(
        _dense_single_kernel,
        K=kernel_size, dilation=dilation, padding=padding, L=L,
        negative_slope=negative_slope)

    out_flat = pl.pallas_call(
        kern,
        out_shape=jax.ShapeDtypeStruct((C_tot, N * L), jnp.float32),
        grid_spec=pltpu.PrefetchScalarGridSpec(
            num_scalar_prefetch=0,
            grid=(N // batch_block,),
            in_specs=[
                pl.BlockSpec((C_in, nl_blk), lambda n: (0, n)),
                pl.BlockSpec((C_out, kernel_size * C_in), lambda n: (0, 0)),
                pl.BlockSpec((C_out, 1), lambda n: (0, 0)),
            ],
            out_specs=pl.BlockSpec((C_tot, nl_blk), lambda n: (0, n)),
        ),
        compiler_params=pltpu.CompilerParams(
            dimension_semantics=("parallel",),
            vmem_limit_bytes=vmem_limit),
    )(x_flat, w2d, bias)

    # Back to PyTorch's NCL layout (cheap XLA transpose outside the kernel).
    return jnp.transpose(out_flat.reshape(C_tot, N, L), (1, 0, 2))


def _reference(x_ncl, weight, gamma, beta, mean, var, *,
               padding, stride, dilation, eps=1e-5, slope=0.01):
    y = lax.conv_general_dilated(
        x_ncl, weight, window_strides=(stride,), padding=[(padding, padding)],
        rhs_dilation=(dilation,), dimension_numbers=("NCH", "OIH", "NCH"))
    y = (y - mean[None, :, None]) / jnp.sqrt(var[None, :, None] + eps)
    y = y * gamma[None, :, None] + beta[None, :, None]
    y = jnp.where(y > 0, y, slope * y)
    return jnp.concatenate([x_ncl, y], axis=1)


if __name__ == "__main__":
    # Module hyperparameters (chosen so conv preserves length -> cat is valid).
    input_size, output_size = 4, 8
    kernel_size, padding, stride, dilation = 3, 1, 1, 1
    dropout = 0.1  # identity at inference

    N, L = 2, 16
    key = jax.random.PRNGKey(0)
    kx, kw, kg, kb, km, kv = jax.random.split(key, 6)

    x = jax.random.normal(kx, (N, input_size, L), jnp.float32)
    fan_in = input_size * kernel_size
    weight = jax.random.normal(kw, (output_size, input_size, kernel_size),
                               jnp.float32) * (1.0 / jnp.sqrt(fan_in))
    gamma = 1.0 + 0.1 * jax.random.normal(kg, (output_size,), jnp.float32)
    beta = 0.1 * jax.random.normal(kb, (output_size,), jnp.float32)
    running_mean = 0.1 * jax.random.normal(km, (output_size,), jnp.float32)
    running_var = jax.random.uniform(kv, (output_size,), jnp.float32,
                                     minval=0.5, maxval=1.5)

    out = dense_single_forward(
        x, weight, gamma, beta, running_mean, running_var,
        kernel_size=kernel_size, padding=padding, stride=stride,
        dilation=dilation)
    out = jax.block_until_ready(out)

    ref = _reference(x, weight, gamma, beta, running_mean, running_var,
                     padding=padding, stride=stride, dilation=dilation)

    assert out.shape == (N, input_size + output_size, L), out.shape
    assert jnp.allclose(out, ref, atol=1e-4, rtol=1e-4), float(
        jnp.max(jnp.abs(out - ref)))

    print("KERNEL_OK")
</pallas_src>

<mosaic_0001>
module attributes {stable_mosaic.version = 11 : i64} {
  func.func @_dense_single_kernel(%arg0: i32, %arg1: memref<4x32xf32, #tpu.memory_space<vmem>>, %arg2: memref<8x12xf32, #tpu.memory_space<vmem>>, %arg3: memref<8x1xf32, #tpu.memory_space<vmem>>, %arg4: memref<12x32xf32, #tpu.memory_space<vmem>>) attributes {dimension_semantics = [#tpu.dimension_semantics<parallel>], iteration_bounds = array<i64: 1>, scalar_prefetch = 0 : i64, scratch_operands = 0 : i64, tpu.core_type = #tpu.core_type<tc>, window_params = [{transform_indices = @transform_0, window_bounds = array<i64: 4, 32>}, {pipeline_mode = #tpu.pipeline_mode<synchronous>, transform_indices = @transform_1, window_bounds = array<i64: 8, 12>}, {pipeline_mode = #tpu.pipeline_mode<synchronous>, transform_indices = @transform_2, window_bounds = array<i64: 8, 1>}, {transform_indices = @transform_3, window_bounds = array<i64: 12, 32>}]} {
    %c0 = arith.constant 0 : index
    %c0_0 = arith.constant 0 : index
    %0 = vector.load %arg1[%c0, %c0_0] : memref<4x32xf32, #tpu.memory_space<vmem>>, vector<4x32xf32>
    %c0_1 = arith.constant 0 : index
    %c0_2 = arith.constant 0 : index
    %1 = vector.load %arg2[%c0_1, %c0_2] : memref<8x12xf32, #tpu.memory_space<vmem>>, vector<8x12xf32>
    %c0_3 = arith.constant 0 : index
    %c0_4 = arith.constant 0 : index
    %2 = vector.load %arg3[%c0_3, %c0_4] : memref<8x1xf32, #tpu.memory_space<vmem>>, vector<8x1xf32>
    %3 = tpu.iota {dimensions = array<i32: 1>} : vector<4x32xi32>
    %c16_i32 = arith.constant 16 : i32
    %c0_i32 = arith.constant 0 : i32
    %4 = arith.cmpi eq, %c16_i32, %c0_i32 : i32
    %c1_i32 = arith.constant 1 : i32
    %5 = arith.select %4, %c1_i32, %c16_i32 : i32
    %6 = vector.broadcast %5 : i32 to vector<4x32xi32>
    %7 = arith.remsi %3, %6 : vector<4x32xi32>
    %c0_i32_5 = arith.constant 0 : i32
    %8 = vector.broadcast %c0_i32_5 : i32 to vector<4x32xi32>
    %9 = arith.cmpi ne, %7, %8 : vector<4x32xi32>
    %c0_i32_6 = arith.constant 0 : i32
    %10 = vector.broadcast %c0_i32_6 : i32 to vector<4x32xi32>
    %11 = arith.cmpi slt, %7, %10 : vector<4x32xi32>
    %c0_i32_7 = arith.constant 0 : i32
    %12 = arith.cmpi slt, %5, %c0_i32_7 : i32
    %13 = vector.broadcast %12 : i1 to vector<4x32xi1>
    %14 = vector.broadcast %13 : vector<4x32xi1> to vector<4x32xi1>
    %15 = arith.xori %11, %14 : vector<4x32xi1>
    %16 = arith.andi %15, %9 : vector<4x32xi1>
    %17 = vector.broadcast %5 : i32 to vector<4x32xi32>
    %18 = arith.addi %7, %17 : vector<4x32xi32>
    %19 = arith.select %16, %18, %7 : vector<4x32xi1>, vector<4x32xi32>
    %cst = arith.constant 0.000000e+00 : f32
    %20 = vector.broadcast %cst : f32 to vector<4x1xf32>
    %21 = vector.extract_strided_slice %0 {offsets = [0, 0], sizes = [4, 31], strides = [1, 1]} : vector<4x32xf32> to vector<4x31xf32>
    %22 = tpu.concatenate %20, %21 in 1 : vector<4x1xf32>, vector<4x31xf32> -> vector<4x32xf32>
    %c-1_i32 = arith.constant -1 : i32
    %23 = vector.broadcast %c-1_i32 : i32 to vector<4x32xi32>
    %24 = arith.addi %19, %23 : vector<4x32xi32>
    %c0_i32_8 = arith.constant 0 : i32
    %25 = vector.broadcast %c0_i32_8 : i32 to vector<4x32xi32>
    %26 = arith.cmpi sge, %24, %25 : vector<4x32xi32>
    %c-1_i32_9 = arith.constant -1 : i32
    %27 = vector.broadcast %c-1_i32_9 : i32 to vector<4x32xi32>
    %28 = arith.addi %19, %27 : vector<4x32xi32>
    %c16_i32_10 = arith.constant 16 : i32
    %29 = vector.broadcast %c16_i32_10 : i32 to vector<4x32xi32>
    %30 = arith.cmpi slt, %28, %29 : vector<4x32xi32>
    %31 = arith.andi %26, %30 : vector<4x32xi1>
    %cst_11 = arith.constant 0.000000e+00 : f32
    %32 = vector.broadcast %cst_11 : f32 to vector<4x32xf32>
    %33 = arith.select %31, %22, %32 : vector<4x32xi1>, vector<4x32xf32>
    %cst_12 = arith.constant 0.000000e+00 : f32
    %34 = vector.broadcast %cst_12 : f32 to vector<4x1xf32>
    %35 = vector.extract_strided_slice %0 {offsets = [0, 1], sizes = [4, 31], strides = [1, 1]} : vector<4x32xf32> to vector<4x31xf32>
    %36 = tpu.concatenate %35, %34 in 1 : vector<4x31xf32>, vector<4x1xf32> -> vector<4x32xf32>
    %c1_i32_13 = arith.constant 1 : i32
    %37 = vector.broadcast %c1_i32_13 : i32 to vector<4x32xi32>
    %38 = arith.addi %19, %37 : vector<4x32xi32>
    %c0_i32_14 = arith.constant 0 : i32
    %39 = vector.broadcast %c0_i32_14 : i32 to vector<4x32xi32>
    %40 = arith.cmpi sge, %38, %39 : vector<4x32xi32>
    %c1_i32_15 = arith.constant 1 : i32
    %41 = vector.broadcast %c1_i32_15 : i32 to vector<4x32xi32>
    %42 = arith.addi %19, %41 : vector<4x32xi32>
    %c16_i32_16 = arith.constant 16 : i32
    %43 = vector.broadcast %c16_i32_16 : i32 to vector<4x32xi32>
    %44 = arith.cmpi slt, %42, %43 : vector<4x32xi32>
    %45 = arith.andi %40, %44 : vector<4x32xi1>
    %cst_17 = arith.constant 0.000000e+00 : f32
    %46 = vector.broadcast %cst_17 : f32 to vector<4x32xf32>
    %47 = arith.select %45, %36, %46 : vector<4x32xi1>, vector<4x32xf32>
    %48 = tpu.concatenate %33, %0, %47 in 0 : vector<4x32xf32>, vector<4x32xf32>, vector<4x32xf32> -> vector<12x32xf32>
    %cst_18 = arith.constant dense<0.000000e+00> : vector<8x32xf32>
    %49 = tpu.matmul %1, %48, %cst_18 {dimension_numbers = #tpu.dot_dimension_numbers<[1], [0], [0], [1], [0, 0, 1, 1], [], []>} : vector<8x12xf32>, vector<12x32xf32>, vector<8x32xf32> -> vector<8x32xf32>
    %50 = vector.broadcast %2 : vector<8x1xf32> to vector<8x32xf32>
    %51 = arith.addf %49, %50 : vector<8x32xf32>
    %cst_19 = arith.constant 0.000000e+00 : f32
    %52 = vector.broadcast %cst_19 : f32 to vector<8x32xf32>
    %53 = arith.cmpf ogt, %51, %52 : vector<8x32xf32>
    %cst_20 = arith.constant 0.00999999977 : f32
    %54 = vector.broadcast %cst_20 : f32 to vector<8x32xf32>
    %55 = arith.mulf %54, %51 : vector<8x32xf32>
    %56 = arith.select %53, %51, %55 : vector<8x32xi1>, vector<8x32xf32>
    %57 = tpu.concatenate %0, %56 in 0 : vector<4x32xf32>, vector<8x32xf32> -> vector<12x32xf32>
    %c0_21 = arith.constant 0 : index
    %c0_22 = arith.constant 0 : index
    %58 = vector.load %arg4[%c0_21, %c0_22] : memref<12x32xf32, #tpu.memory_space<vmem>>, vector<12x32xf32>
    tpu.vector_store %arg4[%c0_21, %c0_22], %57 {strides = array<i32>} : memref<12x32xf32, #tpu.memory_space<vmem>>, vector<12x32xf32>,
    return
  }
  func.func @transform_0(%arg0: i32) -> (i32, i32) {
    %c0_i32 = arith.constant 0 : i32
    %c0_i32_0 = arith.constant 0 : i32
    return %c0_i32, %arg0 : i32, i32
  }
  func.func @transform_1(%arg0: i32) -> (i32, i32) {
    %c0_i32 = arith.constant 0 : i32
    %c0_i32_0 = arith.constant 0 : i32
    %c0_i32_1 = arith.constant 0 : i32
    return %c0_i32, %c0_i32_0 : i32, i32
  }
  func.func @transform_2(%arg0: i32) -> (i32, i32) {
    %c0_i32 = arith.constant 0 : i32
    %c0_i32_0 = arith.constant 0 : i32
    %c0_i32_1 = arith.constant 0 : i32
    return %c0_i32, %c0_i32_0 : i32, i32
  }
  func.func @transform_3(%arg0: i32) -> (i32, i32) {
    %c0_i32 = arith.constant 0 : i32
    %c0_i32_0 = arith.constant 0 : i32
    return %c0_i32, %arg0 : i32, i32
  }
}

</mosaic_0001>

<bundles_post_ra>
// kernel: tpu_custom_call.1
= control target key start
LH: loop header
LB: loop body
LE: loop exit
PB: predicated region body
PF: predicated region fallthrough
CT: control target
= control target key end

     0   :  { %8 = vsyncpa [#allocation3], 0  ;;  %s290_s0 = inlined_call_operand.hbm [shape: f32[4,32], index: 0, kind: input, shape index: {}]   ;;  %s291_s1 = inlined_call_operand.vmem [shape: f32[8,12], index: 1, kind: input, shape index: {}]   ;;  %s292_s2 = inlined_call_operand.vmem [shape: f32[8,1], index: 2, kind: input, shape index: {}]   ;;  %s293_s3 = inlined_call_operand.hbm [shape: f32[12,32], index: 3, kind: output, shape index: {}]  }
   0x1   :  { %9 = vsyncpa [#allocation4], 0  ;;  %s246_s12 = smov [#allocation2]  }
   0x2   :  { %s16_s13 = sshll.u32 %s246_s12, 4  ;;  %s17_s13 = int_to_ptr.vmem [resolvable:$true] %s16_s13 }
   0x3   :  { %s210_s14 = scalar_lea.vmem %s17_s13, 64  ;;  %p215_p1 = scmp.lt.s32.totalorder %s17_s13, %s17_s13 }
   0x4   :  { %p211_p0 = scmp.ne.s32.totalorder %s17_s13, %s210_s14  ;;  %p216_p2 = scmp.lt.s32.totalorder %s210_s14, %s210_s14 }
   0x6   :  { %p217_p3 = por %p216_p2, %p215_p1 }
   0x8   :  { %p218_p4 = pnand %p217_p3, %p211_p0 }
   0xa   :  { %221 = shalt.err (!%p218_p4)
}
   0xb   :  { %19 = dma.hbm_to_vmem [thread:$0]  %s290_s0, 64, %s17_s13, [#allocation3]  }
   0xc   :  { %242 = dma.done.wait [#allocation3], 64  }
   0xd   :  { %243 = vsyncadd [#allocation3], 4294967232  ;;  %v247_v0 = vmov 0.0   ;;  %vm248_vm0 = vmmov 0   ;;  %v249_v1 = vmov 0   ;;  %v29_v3 = vld [vmem:[%s292_s2] sm:$0xff]  ;;  %v30_v4 = vlaneseq }
   0xe   :  { %184 = vmatprep.subr.mxu0 %v247_v0  ;;  %188 = vmatprep.mubr.msk.f32.mxu0 %vm248_vm0, %v247_v0  ;;  %v27_v2 = vld [vmem:[#allocation2] sm:$0xf]  ;;  %s250_s19 = smov 127   ;;  %s251_s20 = smov 1   ;;  %vm58_vm1 = vcmask 252928   ;;  %vm67_vm3 = vcmask 1043456  }
   0xf   :  { %200 = vset.pattern.permute.xlu1 %v249_v1  ;;  %201 = vset.pattern.permute.xlu0 %v249_v1  ;;  %v31_v5 = vand.u32 127, %v30_v4  ;;  %vm48_vm4 = vcmask 7168   ;;  %v65_v12 = vrot.slane %v27_v2, 4  ;;  %v28_v16 = vld [vmem:[%s291_s1] sm:$0xff]  ;;  %vm74_vm6 = vcmask 97280   ;;  %s252_s21 = smov [#allocation5]  }
  0x10   :  { %55 = vrot.lane.b32.xlu0 %v27_v2, %s250_s19  ;;  %71 = vperm.xlu1 %200, %v29_v3   ;;  %s167_s22 = sshll.u32 %s252_s21, 4  ;;  %vm160_vm8 = vcmask 257024   ;;  %vm158_vm9 = vcmask 261120   ;;  %s168_s22 = int_to_ptr.vmem [resolvable:$true] %s167_s22 }
  0x11   :  { %v36_v6 = vand.u32 15, %v31_v5  ;;  %s222_s1 = scalar_lea.vmem %s168_s22, 256  ;;  %p227_p6 = scmp.lt.s32.totalorder %s168_s22, %s168_s22 }
  0x12   :  { %p223_p5 = scmp.ne.s32.totalorder %s168_s22, %s222_s1  ;;  %p228_p7 = scmp.lt.s32.totalorder %s222_s1, %s222_s1 }
  0x13   :  { %v60_v7 = vadd.s32 1, %v36_v6  ;;  %v50_v8 = vadd.s32 4294967295, %v36_v6 }
  0x14   :  { %45 = vrot.lane.b32.xlu0 %v27_v2, %s251_s20  ;;  %p229_p8 = por %p228_p7, %p227_p6 }
  0x15   :  { %vm62_vm2 = vcmp.lt.s32.totalorder %v60_v7, 16  ;;  %vm51_vm5 = vcmp.ge.s32.totalorder %v50_v8, 0 }
  0x16   :  { %p230_p9 = pnand %p229_p8, %p223_p5 }
  0x82   :  { %v56_v9 = vpop.permute.xlu0 %55 }
  0x83   :  { %v59_v10 = vsel %vm58_vm1, %v56_v9, 0.0 }
  0x84   :  { %v64_v11 = vsel %vm62_vm2, %v59_v10, 0.0 }
  0x85   :  { %185 = vmatpush3.msk.msra.mxu0 %vm67_vm3, %v64_v11 }
  0x86   :  { %v46_v13 = vpop.permute.xlu0 %45  ;;  %186 = vmatprep.subr.mxu0 %v247_v0 }
  0x87   :  { %v49_v14 = vsel %vm48_vm4, 0.0, %v46_v13 }
  0x88   :  { %v54_v15 = vsel %vm51_vm5, %v49_v14, 0.0 }
  0x89   :  { %v68_v17 = vsel %vm67_vm3, %v54_v15, %v65_v12 }
  0x8a   :  { %187 = vmatpush3.msra.mxu0 %v68_v17 }
  0x8b   :  { %189 = vmatmul.mubr.msk.f32.vlgmr.msra.gmra.mxu0 %vm74_vm6, %v28_v16  ;;  %v72_v18 = vpop.permute.xlu1 %71 }
 0x14b   :  { %v147_v19 = vpop.f32.mrf.mxu0 }
 0x14c   :  { %v148_v20 = vadd.f32 %v147_v19, %v72_v18 }
 0x14d   :  { %v190_v21 = vpop.f32.mrf.mxu0 }
 0x14e   :  { %vm151_vm7 = vcmp.gt.f32.partialorder %v148_v20, 0.0  ;;  %v152_v22 = vmul.f32 0.01, %v148_v20 }
 0x150   :  { %v153_v23 = vsel %vm151_vm7, %v148_v20, %v152_v22 }
 0x151   :  { %v155_v24 = vrot.slane %v153_v23, 4 }
 0x153   :  { %v157_v25 = vsel %vm67_vm3, %v27_v2, %v155_v24  ;;  %161 = vst.msk [vmem:[#allocation5 + $0x8] sm:$0xf] %vm160_vm8, %v155_v24 }
 0x154   :  { %159 = vst.msk [vmem:[#allocation5] sm:$0xff] %vm158_vm9, %v157_v25 }
 0x155   :  { %233 = shalt.err (!%p230_p9)
}
 0x156   :  { %s253_s23 = smov 128   ;;  %s254_s24 = smov 8  }
 0x157   :  { %173 = dma.vmem_to_hbm [thread:$0]  %s168_s22, 256, %s293_s3, [#allocation4], %s253_s23, %s253_s23, %s254_s24  }
 0x158   :  { %244 = dma.done.wait [#allocation4], 256  }
 0x159   :  { %245 = vsyncadd [#allocation4], 4294967040 }
 0x15a   :  { %177 = vsyncpa [#allocation3], 1 }
 0x15b   :  { %178 = vsyncpa [#allocation4], 1 }

</bundles_post_ra>
